<compile_context>
chip_gen: v7x
topology: tpu7x:2x2x1
jax: 0.10.0
libtpu: 0.0.40
codegen_flags: <defaults>
</compile_context>

<pallas_src>
import jax
import jax.numpy as jnp
from jax.experimental import pallas as pl
from jax.experimental.pallas import tpu as pltpu

STATE_DIM = 14


def _segway_kernel(u_ref, x_ref, o_ref):
    # u_ref: SMEM (1,) f32 scalar-prefetch.
    # x_ref / o_ref: VMEM (14, TILE_N) f32, lane-dense (batch on lanes).
    u = u_ref[0]

    y      = x_ref[0:1, :]
    x_dot  = x_ref[1:2, :]
    y_dot  = x_ref[2:3, :]
    c1 = x_ref[3:4, :] * 1.8
    c2 = x_ref[4:5, :] * 11.5
    c3 = x_ref[5:6, :] * 10.9
    c4 = x_ref[6:7, :] * 68.4
    c5 = x_ref[7:8, :] * 1.2
    d1 = x_ref[8:9, :] * 9.3
    d2 = x_ref[9:10, :] * 58.8
    d3 = x_ref[10:11, :] * 38.6
    d4 = x_ref[11:12, :] * 234.5
    d5 = x_ref[12:13, :] * 208.3
    b  = x_ref[13:14, :] * 24.7

    cos_y = jnp.cos(y)
    sin_y = jnp.sin(y)
    y_dot2 = y_dot * y_dot

    # Exact reciprocals (approx=False keeps the 1e-5 tolerance vs reference).
    inv1 = pl.reciprocal(cos_y - b, approx=False)
    inv2 = pl.reciprocal(cos_y * cos_y - b, approx=False)

    x_ddot = (cos_y * (-c1 * u + c2 * x_dot + 9.8 * sin_y)
              - c3 * u + c4 * x_dot - c5 * y_dot2 * sin_y) * inv1
    y_ddot = ((d1 * u - d2 * x_dot) * cos_y + d3 * u - d4 * x_dot
              - sin_y * (d5 + y_dot2 * cos_y)) * inv2

    # Zero the output block once, then overwrite the 3 live rows with
    # full-lane-width stores (no concatenate, no lane shuffles).
    o_ref[...] = jnp.zeros_like(o_ref)
    o_ref[0:1, :] = y_dot
    o_ref[1:2, :] = x_ddot
    o_ref[2:3, :] = y_ddot


def _round_up(v, m):
    return ((v + m - 1) // m) * m


def _reference_forward(x, u=0.0):
    """Pure-JAX reference mirroring the PyTorch module (also the tiny-batch path)."""
    y = x[:, 0:1]
    x_dot = x[:, 1:2]
    y_dot = x[:, 2:3]
    c1 = x[:, 3:4] * 1.8
    c2 = x[:, 4:5] * 11.5
    c3 = x[:, 5:6] * 10.9
    c4 = x[:, 6:7] * 68.4
    c5 = x[:, 7:8] * 1.2
    d1 = x[:, 8:9] * 9.3
    d2 = x[:, 9:10] * 58.8
    d3 = x[:, 10:11] * 38.6
    d4 = x[:, 11:12] * 234.5
    d5 = x[:, 12:13] * 208.3
    b = x[:, 13:14] * 24.7
    zeros = jnp.zeros((x.shape[0], STATE_DIM - 3), dtype=x.dtype)
    a1 = (jnp.cos(y) * (-c1 * u + c2 * x_dot + 9.8 * jnp.sin(y))
          - c3 * u + c4 * x_dot - c5 * y_dot * y_dot * jnp.sin(y)) / (jnp.cos(y) - b)
    a2 = ((d1 * u - d2 * x_dot) * jnp.cos(y) + d3 * u - d4 * x_dot
          - jnp.sin(y) * (d5 + y_dot * y_dot * jnp.cos(y))) / (jnp.cos(y) * jnp.cos(y) - b)
    return jnp.concatenate([y_dot, a1, a2, zeros], axis=1)


def segway_params_sim_forward(x, u=0.0, t=0.0, *, tile_n=2048, use_pallas=None):
    """Pallas equivalent of Segway_params_sim.forward.

    x: (N, 14) float32, u: scalar (broadcast like the torch code), t: unused.
    use_pallas: None -> auto (tiny batches fall back to fused XLA math).
    """
    del t  # unused, as in the reference module
    x = jnp.asarray(x, dtype=jnp.float32)
    n = x.shape[0]

    if use_pallas is None:
        use_pallas = n >= 1024  # below this the pallas_call is pure launch overhead
    if not use_pallas:
        return _reference_forward(x, u)

    # Lane-dense layout: (14, N) — batch on lanes, state dims on sublanes.
    xt = x.T
    tile = tile_n if n >= tile_n else _round_up(max(n, 1), 128)
    n_pad = _round_up(n, tile)
    if n_pad != n:
        # Zero padding keeps both denominators finite (cos(0) - 0 = 1).
        xt = jnp.pad(xt, ((0, 0), (0, n_pad - n)))

    u_arr = jnp.asarray(u, dtype=jnp.float32).reshape((1,))

    grid_spec = pltpu.PrefetchScalarGridSpec(
        num_scalar_prefetch=1,               # u lands in SMEM before the grid runs
        grid=(n_pad // tile,),
        in_specs=[pl.BlockSpec((STATE_DIM, tile), lambda i, u_ref: (0, i))],
        out_specs=pl.BlockSpec((STATE_DIM, tile), lambda i, u_ref: (0, i)),
    )

    out_t = pl.pallas_call(
        _segway_kernel,
        out_shape=jax.ShapeDtypeStruct((STATE_DIM, n_pad), jnp.float32),
        grid_spec=grid_spec,
        compiler_params=pltpu.CompilerParams(
            dimension_semantics=("parallel",)),  # shard batch tiles across TCs (v7x)
    )(u_arr, xt)

    return out_t[:, :n].T


if __name__ == "__main__":
    key = jax.random.PRNGKey(0)
    batch = 300  # small, deliberately not a multiple of 128 to exercise padding
    x = jax.random.normal(key, (batch, STATE_DIM), dtype=jnp.float32)
    u = 0.5

    out = segway_params_sim_forward(x, u=u, use_pallas=True)  # force the kernel path
    out = jax.block_until_ready(out)

    ref = _reference_forward(x, u=u)
    assert out.shape == (batch, STATE_DIM)
    assert bool(jnp.allclose(out, ref, atol=1e-5, rtol=1e-5)), "mismatch vs reference"

    # Also sanity-check the auto-dispatch (tiny batch -> pure JAX) path.
    out_small = jax.block_until_ready(segway_params_sim_forward(x[:8], u=u))
    assert bool(jnp.allclose(out_small, _reference_forward(x[:8], u=u), atol=1e-5, rtol=1e-5))

    print("KERNEL_OK")
</pallas_src>

<mosaic_0001>
module attributes {stable_mosaic.version = 11 : i64} {
  func.func @_segway_kernel(%arg0: i32, %arg1: memref<1xf32, #tpu.memory_space<smem>>, %arg2: memref<14x384xf32, #tpu.memory_space<vmem>>, %arg3: memref<14x384xf32, #tpu.memory_space<vmem>>) attributes {dimension_semantics = [#tpu.dimension_semantics<parallel>], iteration_bounds = array<i64: 1>, scalar_prefetch = 1 : i64, scratch_operands = 0 : i64, tpu.core_type = #tpu.core_type<tc>, window_params = [{transform_indices = @transform_0, window_bounds = array<i64: 14, 384>}, {transform_indices = @transform_1, window_bounds = array<i64: 14, 384>}]} {
    %c0 = arith.constant 0 : index
    %0 = memref.load %arg1[%c0] : memref<1xf32, #tpu.memory_space<smem>>
    %c0_0 = arith.constant 0 : index
    %c0_1 = arith.constant 0 : index
    %1 = vector.load %arg2[%c0_0, %c0_1] : memref<14x384xf32, #tpu.memory_space<vmem>>, vector<1x384xf32>
    %c1 = arith.constant 1 : index
    %c0_2 = arith.constant 0 : index
    %2 = vector.load %arg2[%c1, %c0_2] : memref<14x384xf32, #tpu.memory_space<vmem>>, vector<1x384xf32>
    %c2 = arith.constant 2 : index
    %c0_3 = arith.constant 0 : index
    %3 = vector.load %arg2[%c2, %c0_3] : memref<14x384xf32, #tpu.memory_space<vmem>>, vector<1x384xf32>
    %c3 = arith.constant 3 : index
    %c0_4 = arith.constant 0 : index
    %4 = vector.load %arg2[%c3, %c0_4] : memref<14x384xf32, #tpu.memory_space<vmem>>, vector<1x384xf32>
    %cst = arith.constant 1.800000e+00 : f32
    %5 = vector.broadcast %cst : f32 to vector<1x384xf32>
    %6 = arith.mulf %4, %5 : vector<1x384xf32>
    %c4 = arith.constant 4 : index
    %c0_5 = arith.constant 0 : index
    %7 = vector.load %arg2[%c4, %c0_5] : memref<14x384xf32, #tpu.memory_space<vmem>>, vector<1x384xf32>
    %cst_6 = arith.constant 1.150000e+01 : f32
    %8 = vector.broadcast %cst_6 : f32 to vector<1x384xf32>
    %9 = arith.mulf %7, %8 : vector<1x384xf32>
    %c5 = arith.constant 5 : index
    %c0_7 = arith.constant 0 : index
    %10 = vector.load %arg2[%c5, %c0_7] : memref<14x384xf32, #tpu.memory_space<vmem>>, vector<1x384xf32>
    %cst_8 = arith.constant 1.090000e+01 : f32
    %11 = vector.broadcast %cst_8 : f32 to vector<1x384xf32>
    %12 = arith.mulf %10, %11 : vector<1x384xf32>
    %c6 = arith.constant 6 : index
    %c0_9 = arith.constant 0 : index
    %13 = vector.load %arg2[%c6, %c0_9] : memref<14x384xf32, #tpu.memory_space<vmem>>, vector<1x384xf32>
    %cst_10 = arith.constant 6.840000e+01 : f32
    %14 = vector.broadcast %cst_10 : f32 to vector<1x384xf32>
    %15 = arith.mulf %13, %14 : vector<1x384xf32>
    %c7 = arith.constant 7 : index
    %c0_11 = arith.constant 0 : index
    %16 = vector.load %arg2[%c7, %c0_11] : memref<14x384xf32, #tpu.memory_space<vmem>>, vector<1x384xf32>
    %cst_12 = arith.constant 1.200000e+00 : f32
    %17 = vector.broadcast %cst_12 : f32 to vector<1x384xf32>
    %18 = arith.mulf %16, %17 : vector<1x384xf32>
    %c8 = arith.constant 8 : index
    %c0_13 = arith.constant 0 : index
    %19 = vector.load %arg2[%c8, %c0_13] : memref<14x384xf32, #tpu.memory_space<vmem>>, vector<1x384xf32>
    %cst_14 = arith.constant 9.300000e+00 : f32
    %20 = vector.broadcast %cst_14 : f32 to vector<1x384xf32>
    %21 = arith.mulf %19, %20 : vector<1x384xf32>
    %c9 = arith.constant 9 : index
    %c0_15 = arith.constant 0 : index
    %22 = vector.load %arg2[%c9, %c0_15] : memref<14x384xf32, #tpu.memory_space<vmem>>, vector<1x384xf32>
    %cst_16 = arith.constant 5.880000e+01 : f32
    %23 = vector.broadcast %cst_16 : f32 to vector<1x384xf32>
    %24 = arith.mulf %22, %23 : vector<1x384xf32>
    %c10 = arith.constant 10 : index
    %c0_17 = arith.constant 0 : index
    %25 = vector.load %arg2[%c10, %c0_17] : memref<14x384xf32, #tpu.memory_space<vmem>>, vector<1x384xf32>
    %cst_18 = arith.constant 3.860000e+01 : f32
    %26 = vector.broadcast %cst_18 : f32 to vector<1x384xf32>
    %27 = arith.mulf %25, %26 : vector<1x384xf32>
    %c11 = arith.constant 11 : index
    %c0_19 = arith.constant 0 : index
    %28 = vector.load %arg2[%c11, %c0_19] : memref<14x384xf32, #tpu.memory_space<vmem>>, vector<1x384xf32>
    %cst_20 = arith.constant 2.345000e+02 : f32
    %29 = vector.broadcast %cst_20 : f32 to vector<1x384xf32>
    %30 = arith.mulf %28, %29 : vector<1x384xf32>
    %c12 = arith.constant 12 : index
    %c0_21 = arith.constant 0 : index
    %31 = vector.load %arg2[%c12, %c0_21] : memref<14x384xf32, #tpu.memory_space<vmem>>, vector<1x384xf32>
    %cst_22 = arith.constant 2.083000e+02 : f32
    %32 = vector.broadcast %cst_22 : f32 to vector<1x384xf32>
    %33 = arith.mulf %31, %32 : vector<1x384xf32>
    %c13 = arith.constant 13 : index
    %c0_23 = arith.constant 0 : index
    %34 = vector.load %arg2[%c13, %c0_23] : memref<14x384xf32, #tpu.memory_space<vmem>>, vector<1x384xf32>
    %cst_24 = arith.constant 2.470000e+01 : f32
    %35 = vector.broadcast %cst_24 : f32 to vector<1x384xf32>
    %36 = arith.mulf %34, %35 : vector<1x384xf32>
    %37 = math.cos %1 : vector<1x384xf32>
    %38 = math.sin %1 : vector<1x384xf32>
    %39 = arith.mulf %3, %3 : vector<1x384xf32>
    %40 = arith.subf %37, %36 : vector<1x384xf32>
    %41 = tpu.reciprocal %40 : vector<1x384xf32> -> vector<1x384xf32>
    %42 = arith.mulf %37, %37 : vector<1x384xf32>
    %43 = arith.subf %42, %36 : vector<1x384xf32>
    %44 = tpu.reciprocal %43 : vector<1x384xf32> -> vector<1x384xf32>
    %cst_25 = arith.constant 0.000000e+00 : f32
    %45 = vector.broadcast %cst_25 : f32 to vector<1x384xf32>
    %46 = arith.subf %45, %6 : vector<1x384xf32>
    %47 = vector.broadcast %0 : f32 to vector<1x384xf32>
    %48 = arith.mulf %46, %47 : vector<1x384xf32>
    %49 = arith.mulf %9, %2 : vector<1x384xf32>
    %50 = arith.addf %48, %49 : vector<1x384xf32>
    %cst_26 = arith.constant 9.800000e+00 : f32
    %51 = vector.broadcast %cst_26 : f32 to vector<1x384xf32>
    %52 = arith.mulf %51, %38 : vector<1x384xf32>
    %53 = arith.addf %50, %52 : vector<1x384xf32>
    %54 = arith.mulf %37, %53 : vector<1x384xf32>
    %55 = vector.broadcast %0 : f32 to vector<1x384xf32>
    %56 = arith.mulf %12, %55 : vector<1x384xf32>
    %57 = arith.subf %54, %56 : vector<1x384xf32>
    %58 = arith.mulf %15, %2 : vector<1x384xf32>
    %59 = arith.addf %57, %58 : vector<1x384xf32>
    %60 = arith.mulf %18, %39 : vector<1x384xf32>
    %61 = arith.mulf %60, %38 : vector<1x384xf32>
    %62 = arith.subf %59, %61 : vector<1x384xf32>
    %63 = arith.mulf %62, %41 : vector<1x384xf32>
    %64 = vector.broadcast %0 : f32 to vector<1x384xf32>
    %65 = arith.mulf %21, %64 : vector<1x384xf32>
    %66 = arith.mulf %24, %2 : vector<1x384xf32>
    %67 = arith.subf %65, %66 : vector<1x384xf32>
    %68 = arith.mulf %67, %37 : vector<1x384xf32>
    %69 = vector.broadcast %0 : f32 to vector<1x384xf32>
    %70 = arith.mulf %27, %69 : vector<1x384xf32>
    %71 = arith.addf %68, %70 : vector<1x384xf32>
    %72 = arith.mulf %30, %2 : vector<1x384xf32>
    %73 = arith.subf %71, %72 : vector<1x384xf32>
    %74 = arith.mulf %39, %37 : vector<1x384xf32>
    %75 = arith.addf %33, %74 : vector<1x384xf32>
    %76 = arith.mulf %38, %75 : vector<1x384xf32>
    %77 = arith.subf %73, %76 : vector<1x384xf32>
    %78 = arith.mulf %77, %44 : vector<1x384xf32>
    %cst_27 = arith.constant 0.000000e+00 : f32
    %79 = vector.broadcast %cst_27 : f32 to vector<14x384xf32>
    %c0_28 = arith.constant 0 : index
    %c0_29 = arith.constant 0 : index
    %80 = vector.load %arg3[%c0_28, %c0_29] : memref<14x384xf32, #tpu.memory_space<vmem>>, vector<14x384xf32>
    tpu.vector_store %arg3[%c0_28, %c0_29], %79 {strides = array<i32>} : memref<14x384xf32, #tpu.memory_space<vmem>>, vector<14x384xf32>,
    %c0_30 = arith.constant 0 : index
    %c0_31 = arith.constant 0 : index
    %81 = vector.load %arg3[%c0_30, %c0_31] : memref<14x384xf32, #tpu.memory_space<vmem>>, vector<1x384xf32>
    tpu.vector_store %arg3[%c0_30, %c0_31], %3 {strides = array<i32>} : memref<14x384xf32, #tpu.memory_space<vmem>>, vector<1x384xf32>,
    %c1_32 = arith.constant 1 : index
    %c0_33 = arith.constant 0 : index
    %82 = vector.load %arg3[%c1_32, %c0_33] : memref<14x384xf32, #tpu.memory_space<vmem>>, vector<1x384xf32>
    tpu.vector_store %arg3[%c1_32, %c0_33], %63 {strides = array<i32>} : memref<14x384xf32, #tpu.memory_space<vmem>>, vector<1x384xf32>,
    %c2_34 = arith.constant 2 : index
    %c0_35 = arith.constant 0 : index
    %83 = vector.load %arg3[%c2_34, %c0_35] : memref<14x384xf32, #tpu.memory_space<vmem>>, vector<1x384xf32>
    tpu.vector_store %arg3[%c2_34, %c0_35], %78 {strides = array<i32>} : memref<14x384xf32, #tpu.memory_space<vmem>>, vector<1x384xf32>,
    return
  }
  func.func @transform_0(%arg0: i32, %arg1: memref<1xf32, #tpu.memory_space<smem>>) -> (i32, i32) {
    %c0_i32 = arith.constant 0 : i32
    %c0_i32_0 = arith.constant 0 : i32
    return %c0_i32, %arg0 : i32, i32
  }
  func.func @transform_1(%arg0: i32, %arg1: memref<1xf32, #tpu.memory_space<smem>>) -> (i32, i32) {
    %c0_i32 = arith.constant 0 : i32
    %c0_i32_0 = arith.constant 0 : i32
    return %c0_i32, %arg0 : i32, i32
  }
}

</mosaic_0001>

<bundles_post_ra>
// kernel: tpu_custom_call.1
= control target key start
LH: loop header
LB: loop body
LE: loop exit
PB: predicated region body
PF: predicated region fallthrough
CT: control target
= control target key end

     0   :  { %8 = vsyncpa [#allocation5], 0  ;;  %s527_s0 = inlined_call_operand.<no memory space> [shape: f32[1], index: 0, kind: input, shape index: {}]   ;;  %s528_s1 = inlined_call_operand.hbm [shape: f32[14,384], index: 1, kind: input, shape index: {}]   ;;  %s529_s2 = inlined_call_operand.hbm [shape: f32[14,384], index: 2, kind: output, shape index: {}]  }
   0x1   :  { %9 = vsyncpa [#allocation6], 0  ;;  %s420_s9 = smov [#allocation4]   ;;  %s372_s13 = scalar_lea.hbm %s528_s1, 768 }
   0x2   :  { %s15_s10 = sshll.u32 %s420_s9, 4  ;;  %p373_p0 = scmp.ne.s32.totalorder %s528_s1, %s372_s13  ;;  %s16_s10 = int_to_ptr.vmem [resolvable:$true] %s15_s10 }
   0x3   :  { %p376_p1 = scmp.lt.u32.totalorder %s372_s13, %s528_s1 }
   0x5   :  { %p378_p2 = pnand %p376_p1, %p373_p0 }
   0x7   :  { %381 = shalt.err (!%p378_p2)
}
   0x8   :  { %s382_s18 = scalar_lea.vmem %s16_s10, 768  ;;  %p387_p4 = scmp.lt.s32.totalorder %s16_s10, %s16_s10 }
   0x9   :  { %p383_p3 = scmp.ne.s32.totalorder %s16_s10, %s382_s18  ;;  %p388_p5 = scmp.lt.s32.totalorder %s382_s18, %s382_s18 }
   0xb   :  { %p389_p6 = por %p388_p5, %p387_p4 }
   0xd   :  { %p390_p7 = pnand %p389_p6, %p383_p3 }
   0xf   :  { %393 = shalt.err (!%p390_p7)
}
  0x10   :  { %s421_s19 = smov 384   ;;  %s422_s20 = smov 24  }
  0x11   :  { %21 = dma.hbm_to_vmem [thread:$0]  %s528_s1, 768, %s16_s10, [#allocation5], %s421_s19, %s421_s19, %s422_s20  }
  0x12   :  { %416 = dma.done.wait [#allocation5], 768  }
  0x13   :  { %417 = vsyncadd [#allocation5], 4294966528  ;;  %v423_v0 = vmov 0.0   ;;  %v312_v1 = vlaneseq  ;;  %v465_v3 = vld [vmem:[#allocation4] ss:$8 sm:$0x7] }
  0x14   :  { %306 = vst [vmem:[#allocation7] sm:$0xff] %v423_v0  ;;  %307 = vst [vmem:[#allocation7 + $0x8] sm:$0xff] %v423_v0  ;;  %v467_v4 = vld [vmem:[#allocation4 + $0x2] ss:$8 sm:$0x7]  ;;  %v67_v5 = vand.u32 2139095040, %v465_v3  ;;  %vm156_vm14 = vweird.f32 %v465_v3 }
  0x15   :  { %308 = vst [vmem:[#allocation7 + $0x10] sm:$0xff] %v423_v0  ;;  %309 = vst [vmem:[#allocation7 + $0x18] sm:$0x3f] %v423_v0  ;;  %vm461_vm0 = vcmp.lt.s32.totalorder %v312_v1, 384  ;;  %v64_v7 = vand.u32 2147483647, %v465_v3 }
  0x16   :  { %310 = vst [vmem:[#allocation7 + $0x20] sm:$0x3f] %v423_v0  ;;  %311 = vst [vmem:[#allocation7 + $0x28] sm:$0x3f] %v423_v0  ;;  %v68_v6 = vshrl.u32 %v67_v5, 23  ;;  %vm66_vm8 = vcmp.lt.s32.totalorder %v465_v3, 0 }
  0x17   :  { %316 = vst.msk [vmem:[#allocation7] ss:$8 sm:$0x7] %vm461_vm0, %v467_v4  ;;  %v71_v10 = vand.u32 8388607, %v64_v7 }
  0x18   :  { %v341_v8 = vadd.s32 4294967169, %v68_v6  ;;  %v424_v16 = vmov 683565275   ;;  %v425_v18 = vmov 2475754826  }
  0x19   :  { %v72_v13 = vor.u32 8388608, %v71_v10  ;;  %v426_v20 = vmov 2131351028   ;;  %v427_v22 = vmov 2102212464  }
  0x1a   :  { %v74_v9 = vadd.s32 1, %v341_v8  ;;  %v428_v24 = vmov 920167782   ;;  %v429_v31 = vmov 1326507024  }
  0x1b   :  { %v112_v33 = vshll.u32 %v72_v13, 8  ;;  %vm65_vm9 = vcmp.le.f32.partialorder %v64_v7, 0.7853982  ;;  %v278_v7 = vstv %s527_s0  ;;  %s430_s0 = smov [#allocation7]  }
  0x1c   :  { %vm75_vm1 = vcmp.gt.s32.totalorder %v74_v9, 0  ;;  %s329_s24 = sshll.u32 %s430_s0, 4  ;;  %s330_s24 = int_to_ptr.vmem [resolvable:$true] %s329_s24 }
  0x1d   :  { %v76_v11 = vsel %vm75_vm1, %v74_v9, 0  ;;  %s394_s25 = scalar_lea.vmem %s330_s24, 768  ;;  %p399_p9 = scmp.lt.s32.totalorder %s330_s24, %s330_s24 }
  0x1e   :  { %v78_v12 = vand.u32 31, %v76_v11  ;;  %v77_v14 = vshrl.u32 %v76_v11, 5  ;;  %p395_p8 = scmp.ne.s32.totalorder %s330_s24, %s394_s25  ;;  %p400_p10 = scmp.lt.s32.totalorder %s394_s25, %s394_s25 }
  0x20   :  { %v79_v15 = vsub.s32 32, %v78_v12  ;;  %v81_v17 = vshll.u32 %v424_v16, %v78_v12  ;;  %v84_v19 = vshll.u32 %v425_v18, %v78_v12  ;;  %v87_v21 = vshll.u32 %v426_v20, %v78_v12  ;;  %p401_p11 = por %p400_p10, %p399_p9 }
  0x21   :  { %v90_v23 = vshll.u32 %v427_v22, %v78_v12  ;;  %v93_v25 = vshll.u32 %v428_v24, %v78_v12  ;;  %vm96_vm2 = vcmp.lt.s32.totalorder %v77_v14, 1  ;;  %vm99_vm3 = vcmp.lt.s32.totalorder %v77_v14, 4 }
  0x22   :  { %v80_v26 = vshrl.u32 %v424_v16, %v79_v15  ;;  %v82_v27 = vshrl.u32 %v425_v18, %v79_v15  ;;  %v85_v28 = vshrl.u32 %v426_v20, %v79_v15  ;;  %v88_v29 = vshrl.u32 %v427_v22, %v79_v15  ;;  %p402_p12 = pnand %p401_p11, %p395_p8 }
  0x23   :  { %v91_v30 = vshrl.u32 %v428_v24, %v79_v15  ;;  %v94_v32 = vshrl.u32 %v429_v31, %v79_v15  ;;  %vm97_vm4 = vcmp.lt.s32.totalorder %v77_v14, 2  ;;  %vm98_vm5 = vcmp.lt.s32.totalorder %v77_v14, 3  ;;  %v50_v31 = vld [vmem:[#allocation4 + $0x19] ss:$8 sm:$0x7] }
  0x24   :  { %v83_v34 = vor.u32 %v82_v27, %v81_v17  ;;  %v86_v35 = vor.u32 %v85_v28, %v84_v19  ;;  %v89_v36 = vor.u32 %v88_v29, %v87_v21  ;;  %v35_v28 = vld [vmem:[#allocation4 + $0x4] ss:$8 sm:$0x7] }
  0x25   :  { %v92_v37 = vor.u32 %v91_v30, %v90_v23  ;;  %v95_v38 = vor.u32 %v94_v32, %v93_v25  ;;  %v32_v23 = vld [vmem:[#allocation4 + $0x3] ss:$8 sm:$0x7]  ;;  %v47_v30 = vld [vmem:[#allocation4 + $0x18] ss:$8 sm:$0x7] }
  0x26   :  { %v100_v39 = vsel %vm96_vm2, %v80_v26, %v83_v34  ;;  %v101_v40 = vsel %vm99_vm3, %v89_v36, 2102212464  ;;  %v104_v41 = vsel %vm96_vm2, %v83_v34, %v86_v35  ;;  %v108_v42 = vsel %vm96_vm2, %v86_v35, %v89_v36  ;;  %v490_v32 = vld [vmem:[#allocation4 + $0x1] ss:$8 sm:$0x7] }
  0x27   :  { %v102_v43 = vsel %vm98_vm5, %v86_v35, %v101_v40  ;;  %v105_v44 = vsel %vm99_vm3, %v92_v37, 920167782  ;;  %v109_v45 = vsel %vm99_vm3, %v95_v38, 1326507024  ;;  %v33_v27 = vmul.f32 1.8, %v32_v23 }
  0x28   :  { %v106_v46 = vsel %vm98_vm5, %v89_v36, %v105_v44  ;;  %v110_v47 = vsel %vm98_vm5, %v92_v37, %v109_v45  ;;  %v103_v48 = vsel %vm97_vm4, %v100_v39, %v102_v43  ;;  %v38_v34 = vld [vmem:[#allocation4 + $0x5] ss:$8 sm:$0x7]  ;;  %v48_v36 = vmul.f32 9.3, %v47_v30 }
  0x29   :  { %v107_v49 = vsel %vm97_vm4, %v104_v41, %v106_v46  ;;  %v111_v50 = vsel %vm97_vm4, %v108_v42, %v110_v47  ;;  %v119_v55 = vmul.u32 %v112_v33, %v103_v48  ;;  %v277_v35 = vsub.f32 0.0, %v33_v27  ;;  %v53_v40 = vld [vmem:[#allocation4 + $0x1a] ss:$8 sm:$0x7] }
  0x2a   :  { %v476_v51 = vmul.u32.u64.low %v112_v33, %v111_v50  ;;  %v477_v52 = vmul.u32.u64.high %v112_v33, %v111_v50, %v476_v51  ;;  %v479_v53 = vmul.u32.u64.low %v112_v33, %v107_v49  ;;  %v480_v54 = vmul.u32.u64.high %v112_v33, %v107_v49, %v479_v53  ;;  %v44_v42 = vld [vmem:[#allocation4 + $0x7] ss:$8 sm:$0x7]  ;;  %v62_v46 = vld [vmem:[#allocation4 + $0x1d] ss:$8 sm:$0x7] }
  0x2b   :  { %v36_v33 = vmul.f32 11.5, %v35_v28  ;;  %v51_v37 = vmul.f32 58.8, %v50_v31  ;;  %v39_v41 = vmul.f32 10.9, %v38_v34  ;;  %v279_v43 = vmul.f32 %v278_v7, %v277_v35 }
  0x2c   :  { %vm121_vm6 = vc.u32 %v477_v52, %v479_v53  ;;  %v122_v56 = vadd.s32 1, %v480_v54  ;;  %v120_v6 = vadd.s32 %v479_v53, %v477_v52  ;;  %v293_v47 = vmul.f32 %v278_v7, %v48_v36  ;;  %v56_v52 = vld [vmem:[#allocation4 + $0x1b] ss:$8 sm:$0x7] }
  0x2d   :  { %v280_v44 = vmul.f32 %v36_v33, %v490_v32  ;;  %v294_v48 = vmul.f32 %v51_v37, %v490_v32  ;;  %v54_v50 = vmul.f32 38.6, %v53_v40 }
  0x2e   :  { %v123_v57 = vsel %vm121_vm6, %v122_v56, %v480_v54  ;;  %v59_v54 = vld [vmem:[#allocation4 + $0x1c] ss:$8 sm:$0x7] }
  0x2f   :  { %v124_v58 = vadd.s32 %v123_v57, %v119_v55  ;;  %v63_v55 = vmul.f32 24.7, %v62_v46 }
  0x31   :  { %v125_v59 = vadd.s32 536870912, %v124_v58 }
  0x33   :  { %v126_v60 = vshrl.u32 %v125_v59, 30  ;;  %v41_v59 = vld [vmem:[#allocation4 + $0x6] ss:$8 sm:$0x7] }
  0x35   :  { %v127_v61 = vshll.u32 %v126_v60, 30  ;;  %v150_v19 = vsub.s32 4, %v126_v60 }
  0x37   :  { %v128_v62 = vsub.s32 %v124_v58, %v127_v61  ;;  %v151_v22 = vsel %vm66_vm8, %v150_v19, %v126_v60  ;;  %v271_v58 = vmul.f32 %v467_v4, %v467_v4  ;;  %v45_v60 = vmul.f32 1.2, %v44_v42 }
  0x38   :  { %v153_v26 = vsel %vm65_vm9, 0, %v151_v22 }
  0x39   :  { %v130_v63 = vsub.s32 0, %v128_v62  ;;  %v260_v29 = vadd.s32 3, %v153_v26  ;;  %v157_v38 = vand.u32 3, %v153_v26 }
  0x3b   :  { %v342_v0 = vmin.u32 %v130_v63, %v128_v62  ;;  %v261_v39 = vand.u32 3, %v260_v29  ;;  %vm162_vm10 = vcmp.eq.s32.totalorder %v157_v38, 2  ;;  %vm159_vm12 = vcmp.eq.s32.totalorder %v157_v38, 0 }
  0x3c   :  { %vm158_vm15 = vcmp.lt.s32.totalorder %v157_v38, 2  ;;  %v295_v63 = vsub.f32 %v293_v47, %v294_v48 }
  0x3d   :  { %v132_v1 = vclz %v342_v0  ;;  %vm266_vm11 = vcmp.eq.s32.totalorder %v261_v39, 2  ;;  %vm263_vm13 = vcmp.eq.s32.totalorder %v261_v39, 0  ;;  %vm262_vm1 = vcmp.lt.s32.totalorder %v261_v39, 2 }
  0x3e   :  { %v57_v0 = vmul.f32 234.5, %v56_v52 }
  0x3f   :  { %v343_v5 = vadd.s32 4294967294, %v132_v1 }
  0x40   :  { %v299_v22 = vmul.f32 %v57_v0, %v490_v32 }
  0x41   :  { %vm344_vm7 = vcmp.lt.s32.totalorder %v343_v5, 0 }
  0x42   :  { %v135_v8 = vsel %vm344_vm7, 0, %v343_v5 }
  0x43   :  { %v136_v9 = vsub.s32 32, %v135_v8  ;;  %v137_v10 = vshll.u32 %v128_v62, %v135_v8  ;;  %v140_v11 = vsub.s32 4294967266, %v135_v8  ;;  %v60_v8 = vmul.f32 208.3, %v59_v54 }
  0x45   :  { %v138_v12 = vshrl.u32 %v120_v6, %v136_v9  ;;  %v141_v13 = vadd.s32 127, %v140_v11  ;;  %v281_v6 = vadd.f32 %v280_v44, %v279_v43  ;;  %v297_v11 = vmul.f32 %v278_v7, %v54_v50 }
  0x47   :  { %v139_v14 = vor.u32 %v138_v12, %v137_v10  ;;  %v142_v15 = vshll.u32 %v141_v13, 23  ;;  %v42_v12 = vmul.f32 68.4, %v41_v59 }
  0x49   :  { %v143_v16 = vor.u32 4788187, %v142_v15  ;;  %v146_v17 = vcvt.s32.f32 %v139_v14  ;;  %v285_v15 = vmul.f32 %v278_v7, %v39_v41 }
  0x4b   :  { %v144_v18 = vand.u32 2147483647, %v143_v16 }
  0x4d   :  { %v147_v20 = vmul.f32 %v146_v17, %v144_v18 }
  0x4f   :  { %v148_v21 = vxor.u32 2147483648, %v147_v20 }
  0x51   :  { %v149_v24 = vsel %vm66_vm8, %v148_v21, %v147_v20  ;;  %v289_v20 = vmul.f32 %v271_v58, %v45_v60 }
  0x52   :  { %v152_v25 = vsel %vm65_vm9, %v465_v3, %v149_v24  ;;  %v287_v3 = vmul.f32 %v42_v12, %v490_v32 }
  0x53   :  { %364 = vcosq.f32 %v152_v25 }
  0x54   :  { %366 = vsinq.f32 %v152_v25 }
  0x5d   :  { %v365_v45 = vpop.eup %364 }
  0x5e   :  { %v367_v49 = vpop.eup %366  ;;  %v163_v51 = vxor.u32 2147483648, %v365_v45 }
  0x5f   :  { %v160_v53 = vxor.u32 2147483648, %v367_v49 }
  0x60   :  { %v164_v56 = vsel %vm162_vm10, %v163_v51, %v367_v49  ;;  %v268_v57 = vsel %vm266_vm11, %v163_v51, %v367_v49 }
  0x61   :  { %v161_v61 = vsel %vm159_vm12, %v365_v45, %v160_v53  ;;  %v265_v62 = vsel %vm263_vm13, %v365_v45, %v160_v53 }
  0x62   :  { %v165_v1 = vsel %vm158_vm15, %v161_v61, %v164_v56  ;;  %v269_v5 = vsel %vm262_vm1, %v265_v62, %v268_v57 }
  0x63   :  { %v166_v9 = vsel %vm156_vm14, nan, %v165_v1  ;;  %v270_v10 = vsel %vm156_vm14, nan, %v269_v5 }
  0x64   :  { %v272_v13 = vsub.f32 %v166_v9, %v63_v55  ;;  %v274_v4 = vmul.f32 %v166_v9, %v166_v9  ;;  %v282_v14 = vmul.f32 9.8, %v270_v10  ;;  %v296_v16 = vmul.f32 %v295_v63, %v166_v9 }
  0x65   :  { %v301_v17 = vmul.f32 %v271_v58, %v166_v9  ;;  %v290_v26 = vmul.f32 %v289_v20, %v270_v10 }
  0x66   :  { %368 = vrcp.f32 %v272_v13  ;;  %v275_v18 = vsub.f32 %v274_v4, %v63_v55  ;;  %v283_v19 = vadd.f32 %v282_v14, %v281_v6  ;;  %v298_v21 = vadd.f32 %v297_v11, %v296_v16 }
  0x67   :  { %v302_v23 = vadd.f32 %v301_v17, %v60_v8 }
  0x68   :  { %370 = vrcp.f32 %v275_v18  ;;  %v284_v24 = vmul.f32 %v283_v19, %v166_v9  ;;  %v300_v27 = vsub.f32 %v298_v21, %v299_v22 }
  0x69   :  { %v303_v28 = vmul.f32 %v302_v23, %v270_v10 }
  0x6a   :  { %v286_v25 = vsub.f32 %v284_v24, %v285_v15 }
  0x6b   :  { %v304_v31 = vsub.f32 %v300_v27, %v303_v28 }
  0x6c   :  { %v288_v29 = vadd.f32 %v287_v3, %v286_v25 }
  0x6e   :  { %v291_v30 = vsub.f32 %v288_v29, %v290_v26 }
  0x70   :  { %v369_v33 = vpop.eup %368 }
  0x71   :  { %v292_v34 = vmul.f32 %v369_v33, %v291_v30 }
  0x72   :  { %v371_v35 = vpop.eup %370 }
  0x73   :  { %319 = vst.msk [vmem:[#allocation7 + $0x1] ss:$8 sm:$0x7] %vm461_vm0, %v292_v34  ;;  %v305_v7 = vmul.f32 %v371_v35, %v304_v31 }
  0x75   :  { %322 = vst.msk [vmem:[#allocation7 + $0x2] ss:$8 sm:$0x7] %vm461_vm0, %v305_v7 }
  0x76   :  { %405 = shalt.err (!%p402_p12)
}
  0x77   :  { %s406_s28 = scalar_lea.hbm %s529_s2, 768 }
  0x78   :  { %p407_p13 = scmp.ne.s32.totalorder %s529_s2, %s406_s28  ;;  %p410_p0 = scmp.lt.u32.totalorder %s406_s28, %s529_s2 }
  0x7a   :  { %p412_p1 = pnand %p410_p0, %p407_p13 }
  0x7c   :  { %415 = shalt.err (!%p412_p1)
}
  0x7d   :  { %335 = dma.vmem_to_hbm [thread:$0]  %s330_s24, 768, %s529_s2, [#allocation6], %s421_s19, %s421_s19, %s422_s20  }
  0x7e   :  { %418 = dma.done.wait [#allocation6], 768  }
  0x7f   :  { %419 = vsyncadd [#allocation6], 4294966528 }
  0x80   :  { %339 = vsyncpa [#allocation5], 1 }
  0x81   :  { %340 = vsyncpa [#allocation6], 1 }

</bundles_post_ra>
